<compile_context>
chip_gen: v5e
topology: v5e:2x2
jax: 0.10.0
libtpu: 0.0.40
codegen_flags: <defaults>
</compile_context>

<pallas_src>
import jax
import jax.numpy as jnp
from jax import lax
from jax.experimental import pallas as pl
from jax.experimental.pallas import tpu as pltpu


def _make_mlp_kernel(sub_rows: int, n_sub: int):
    def mlp_kernel(x_ref, w1_ref, b1_ref, w2_ref, b2_ref, o_ref):
        # Load resident params once per grid step (they never change across steps).
        w1 = w1_ref[...]
        b1 = b1_ref[...]          # (1, n_hid) f32
        w2 = w2_ref[...]
        b2 = b2_ref[...]          # (1, n_out) f32
        cdtype = w1.dtype         # compute dtype (f32 or bf16), f32 accumulation always

        def body(s, carry):
            r0 = pl.multiple_of(s * sub_rows, sub_rows)
            rows = pl.ds(r0, sub_rows)
            # In-kernel activation cast: x stays in its native dtype in HBM.
            xs = x_ref[rows, :].astype(cdtype)
            h = jnp.dot(xs, w1, preferred_element_type=jnp.float32)
            # Dropout is identity in eval mode; bias + ReLU in f32 on the VPU.
            h = jnp.maximum(h + b1, 0.0)
            out = jnp.dot(h.astype(cdtype), w2, preferred_element_type=jnp.float32)
            o_ref[rows, :] = (out + b2).astype(o_ref.dtype)
            return carry

        lax.fori_loop(0, n_sub, body, 0, unroll=True)

    return mlp_kernel


def prepare_params(w1, b1, w2, b2, *, compute_dtype=jnp.float32):
    """One-time parameter prep: cast weights to the MXU compute dtype, biases to f32 rows.

    w1: (n_inp, n_hid), w2: (n_hid, n_out)  -- transpose of nn.Linear's (out, in) layout.
    """
    return (
        jnp.asarray(w1, compute_dtype),
        jnp.asarray(b1, jnp.float32).reshape(1, -1),
        jnp.asarray(w2, compute_dtype),
        jnp.asarray(b2, jnp.float32).reshape(1, -1),
    )


def _auto_tm(batch):
    # Target 512-1024 rows per grid step (amortize ~0.35us/step pipeline overhead)
    # while keeping >= 2 grid steps so v7x's two TensorCores both get a batch tile.
    if batch <= 8:
        return batch
    half = (batch // 2 // 8) * 8
    return max(8, min(1024, half))


def _pick_sub(tm):
    # Row sub-tile inside the kernel so the f32 hidden intermediate stays small.
    for s in (256, 128):
        if tm % s == 0:
            return s
    return tm


def mlp_forward(x, params, *, tm=None):
    """x: (B, n_inp); params from prepare_params(). Returns (B, n_out) in x.dtype."""
    w1, b1, w2, b2 = params
    B, n_inp = x.shape
    n_hid = w1.shape[1]
    n_out = w2.shape[1]
    assert w1.shape[0] == n_inp and w2.shape[0] == n_hid
    out_dtype = x.dtype

    if tm is None:
        tm = _auto_tm(B)
    grid_m = pl.cdiv(B, tm)
    Bp = grid_m * tm
    # Only the batch (sublane) axis ever gets padded, and only if B % tm != 0.
    xp = x if Bp == B else jnp.pad(x, ((0, Bp - B), (0, 0)))

    sub = _pick_sub(tm)
    n_sub = tm // sub
    kernel = _make_mlp_kernel(sub, n_sub)

    x_item = jnp.dtype(x.dtype).itemsize
    w_item = jnp.dtype(w1.dtype).itemsize
    o_item = jnp.dtype(out_dtype).itemsize
    w_bytes = (w1.size + w2.size) * w_item + (b1.size + b2.size) * 4

    # Self-consistent estimate: flops and bytes both on the shapes actually executed.
    cost = pl.CostEstimate(
        flops=2 * Bp * (n_inp * n_hid + n_hid * n_out),
        transcendentals=0,
        bytes_accessed=Bp * n_inp * x_item + w_bytes + Bp * n_out * o_item,
    )

    # Explicit VMEM budget: double-buffered x/out tiles + resident weights + h scratch.
    vmem_bytes = (2 * tm * n_inp * x_item + 2 * tm * n_out * o_item
                  + 2 * w_bytes + sub * n_hid * 4)
    vmem_limit = int(min(48 * 1024 * 1024, max(16 * 1024 * 1024, 4 * vmem_bytes)))

    out_p = pl.pallas_call(
        kernel,
        out_shape=jax.ShapeDtypeStruct((Bp, n_out), out_dtype),
        grid_spec=pl.GridSpec(
            grid=(grid_m,),
            in_specs=[
                # x: one (tm, n_inp) row tile per grid step (last dim = full extent).
                pl.BlockSpec((tm, n_inp), lambda i: (i, 0)),
                # Weights/biases: constant block index -> VMEM-resident across steps.
                pl.BlockSpec((n_inp, n_hid), lambda i: (0, 0)),
                pl.BlockSpec((1, n_hid), lambda i: (0, 0)),
                pl.BlockSpec((n_hid, n_out), lambda i: (0, 0)),
                pl.BlockSpec((1, n_out), lambda i: (0, 0)),
            ],
            out_specs=pl.BlockSpec((tm, n_out), lambda i: (i, 0)),
        ),
        compiler_params=pltpu.CompilerParams(
            dimension_semantics=("parallel",),   # batch tiles independent (megacore)
            vmem_limit_bytes=vmem_limit,
        ),
        cost_estimate=cost,
    )(xp, w1, b1, w2, b2)

    return out_p if Bp == B else out_p[:B]


if __name__ == "__main__":
    # Module-consistent shapes: n_inp=32, n_hid=64, n_out=16.  B=1024 exercises
    # tm=512 with a 2-step "parallel" grid and the in-kernel row sub-tiling.
    n_inp, n_hid, n_out = 32, 64, 16
    B = 1024

    key = jax.random.PRNGKey(0)
    kx, kw1, kb1, kw2, kb2 = jax.random.split(key, 5)

    x = jax.random.normal(kx, (B, n_inp), dtype=jnp.float32)
    # Deterministic param init mimicking nn.Linear's uniform(-1/sqrt(fan_in), +).
    lim1 = 1.0 / (n_inp ** 0.5)
    lim2 = 1.0 / (n_hid ** 0.5)
    w1 = jax.random.uniform(kw1, (n_inp, n_hid), jnp.float32, -lim1, lim1)
    b1 = jax.random.uniform(kb1, (n_hid,), jnp.float32, -lim1, lim1)
    w2 = jax.random.uniform(kw2, (n_hid, n_out), jnp.float32, -lim2, lim2)
    b2 = jax.random.uniform(kb2, (n_out,), jnp.float32, -lim2, lim2)

    ref = jnp.maximum(x @ w1 + b1, 0.0) @ w2 + b2

    # fp32 path: strict correctness check.
    params_f32 = prepare_params(w1, b1, w2, b2, compute_dtype=jnp.float32)
    out = mlp_forward(x, params_f32)
    jax.block_until_ready(out)
    assert out.shape == (B, n_out)
    assert jnp.allclose(out, ref, atol=1e-5, rtol=1e-5)

    # Ragged batch (exercises the batch-pad + slice fallback path).
    out_small = mlp_forward(x[:100], params_f32)
    jax.block_until_ready(out_small)
    assert jnp.allclose(out_small, ref[:100], atol=1e-5, rtol=1e-5)

    # bf16 weights + in-kernel bf16 activation cast, f32 accumulation (v6e/v7x fast path).
    params_bf16 = prepare_params(w1, b1, w2, b2, compute_dtype=jnp.bfloat16)
    out_bf16 = mlp_forward(x, params_bf16)
    jax.block_until_ready(out_bf16)
    assert jnp.allclose(out_bf16, ref, atol=5e-2, rtol=5e-2)

    print("KERNEL_OK")
</pallas_src>

<mosaic_0001>
module attributes {stable_mosaic.version = 11 : i64} {
  func.func @mlp_kernel(%arg0: i32, %arg1: memref<512x32xf32, #tpu.memory_space<vmem>>, %arg2: memref<32x64xf32, #tpu.memory_space<vmem>>, %arg3: memref<1x64xf32, #tpu.memory_space<vmem>>, %arg4: memref<64x16xf32, #tpu.memory_space<vmem>>, %arg5: memref<1x16xf32, #tpu.memory_space<vmem>>, %arg6: memref<512x16xf32, #tpu.memory_space<vmem>>) attributes {dimension_semantics = [#tpu.dimension_semantics<parallel>], iteration_bounds = array<i64: 2>, scalar_prefetch = 0 : i64, scratch_operands = 0 : i64, tpu.core_type = #tpu.core_type<tc>, window_params = [{transform_indices = @transform_0, window_bounds = array<i64: 512, 32>}, {pipeline_mode = #tpu.pipeline_mode<synchronous>, transform_indices = @transform_1, window_bounds = array<i64: 32, 64>}, {pipeline_mode = #tpu.pipeline_mode<synchronous>, transform_indices = @transform_2, window_bounds = array<i64: 1, 64>}, {pipeline_mode = #tpu.pipeline_mode<synchronous>, transform_indices = @transform_3, window_bounds = array<i64: 64, 16>}, {pipeline_mode = #tpu.pipeline_mode<synchronous>, transform_indices = @transform_4, window_bounds = array<i64: 1, 16>}, {transform_indices = @transform_5, window_bounds = array<i64: 512, 16>}]} {
    %c0 = arith.constant 0 : index
    %c0_0 = arith.constant 0 : index
    %0 = vector.load %arg2[%c0, %c0_0] : memref<32x64xf32, #tpu.memory_space<vmem>>, vector<32x64xf32>
    %c0_1 = arith.constant 0 : index
    %c0_2 = arith.constant 0 : index
    %1 = vector.load %arg3[%c0_1, %c0_2] : memref<1x64xf32, #tpu.memory_space<vmem>>, vector<1x64xf32>
    %c0_3 = arith.constant 0 : index
    %c0_4 = arith.constant 0 : index
    %2 = vector.load %arg4[%c0_3, %c0_4] : memref<64x16xf32, #tpu.memory_space<vmem>>, vector<64x16xf32>
    %c0_5 = arith.constant 0 : index
    %c0_6 = arith.constant 0 : index
    %3 = vector.load %arg5[%c0_5, %c0_6] : memref<1x16xf32, #tpu.memory_space<vmem>>, vector<1x16xf32>
    %c0_i32 = arith.constant 0 : i32
    %c256_i32 = arith.constant 256 : i32
    %4 = arith.muli %c0_i32, %c256_i32 : i32
    %5 = tpu.assume_multiple %4, 256 : i32
    %6 = arith.index_cast %5 : i32 to index
    %c0_7 = arith.constant 0 : index
    %7 = vector.load %arg1[%6, %c0_7] : memref<512x32xf32, #tpu.memory_space<vmem>>, vector<256x32xf32>
    %cst = arith.constant dense<0.000000e+00> : vector<256x64xf32>
    %8 = tpu.matmul %7, %0, %cst {dimension_numbers = #tpu.dot_dimension_numbers<[1], [0], [0], [1], [0, 0, 1, 1], [], []>} : vector<256x32xf32>, vector<32x64xf32>, vector<256x64xf32> -> vector<256x64xf32>
    %9 = vector.broadcast %1 : vector<1x64xf32> to vector<256x64xf32>
    %10 = arith.addf %8, %9 : vector<256x64xf32>
    %cst_8 = arith.constant 0.000000e+00 : f32
    %11 = vector.broadcast %cst_8 : f32 to vector<256x64xf32>
    %12 = arith.maximumf %10, %11 : vector<256x64xf32>
    %cst_9 = arith.constant dense<0.000000e+00> : vector<256x16xf32>
    %13 = tpu.matmul %12, %2, %cst_9 {dimension_numbers = #tpu.dot_dimension_numbers<[1], [0], [0], [1], [0, 0, 1, 1], [], []>} : vector<256x64xf32>, vector<64x16xf32>, vector<256x16xf32> -> vector<256x16xf32>
    %14 = vector.broadcast %3 : vector<1x16xf32> to vector<256x16xf32>
    %15 = arith.addf %13, %14 : vector<256x16xf32>
    %16 = arith.index_cast %5 : i32 to index
    %c0_10 = arith.constant 0 : index
    %17 = vector.load %arg6[%16, %c0_10] : memref<512x16xf32, #tpu.memory_space<vmem>>, vector<256x16xf32>
    tpu.vector_store %arg6[%16, %c0_10], %15 {strides = array<i32>} : memref<512x16xf32, #tpu.memory_space<vmem>>, vector<256x16xf32>,
    %c1_i32 = arith.constant 1 : i32
    %c256_i32_11 = arith.constant 256 : i32
    %18 = arith.muli %c1_i32, %c256_i32_11 : i32
    %19 = tpu.assume_multiple %18, 256 : i32
    %20 = arith.index_cast %19 : i32 to index
    %c0_12 = arith.constant 0 : index
    %21 = vector.load %arg1[%20, %c0_12] : memref<512x32xf32, #tpu.memory_space<vmem>>, vector<256x32xf32>
    %cst_13 = arith.constant dense<0.000000e+00> : vector<256x64xf32>
    %22 = tpu.matmul %21, %0, %cst_13 {dimension_numbers = #tpu.dot_dimension_numbers<[1], [0], [0], [1], [0, 0, 1, 1], [], []>} : vector<256x32xf32>, vector<32x64xf32>, vector<256x64xf32> -> vector<256x64xf32>
    %23 = vector.broadcast %1 : vector<1x64xf32> to vector<256x64xf32>
    %24 = arith.addf %22, %23 : vector<256x64xf32>
    %cst_14 = arith.constant 0.000000e+00 : f32
    %25 = vector.broadcast %cst_14 : f32 to vector<256x64xf32>
    %26 = arith.maximumf %24, %25 : vector<256x64xf32>
    %cst_15 = arith.constant dense<0.000000e+00> : vector<256x16xf32>
    %27 = tpu.matmul %26, %2, %cst_15 {dimension_numbers = #tpu.dot_dimension_numbers<[1], [0], [0], [1], [0, 0, 1, 1], [], []>} : vector<256x64xf32>, vector<64x16xf32>, vector<256x16xf32> -> vector<256x16xf32>
    %28 = vector.broadcast %3 : vector<1x16xf32> to vector<256x16xf32>
    %29 = arith.addf %27, %28 : vector<256x16xf32>
    %30 = arith.index_cast %19 : i32 to index
    %c0_16 = arith.constant 0 : index
    %31 = vector.load %arg6[%30, %c0_16] : memref<512x16xf32, #tpu.memory_space<vmem>>, vector<256x16xf32>
    tpu.vector_store %arg6[%30, %c0_16], %29 {strides = array<i32>} : memref<512x16xf32, #tpu.memory_space<vmem>>, vector<256x16xf32>,
    %c2_i32 = arith.constant 2 : i32
    return
  }
  func.func @transform_0(%arg0: i32) -> (i32, i32) {
    %c0_i32 = arith.constant 0 : i32
    %c0_i32_0 = arith.constant 0 : i32
    return %arg0, %c0_i32 : i32, i32
  }
  func.func @transform_1(%arg0: i32) -> (i32, i32) {
    %c0_i32 = arith.constant 0 : i32
    %c0_i32_0 = arith.constant 0 : i32
    %c0_i32_1 = arith.constant 0 : i32
    return %c0_i32, %c0_i32_0 : i32, i32
  }
  func.func @transform_2(%arg0: i32) -> (i32, i32) {
    %c0_i32 = arith.constant 0 : i32
    %c0_i32_0 = arith.constant 0 : i32
    %c0_i32_1 = arith.constant 0 : i32
    return %c0_i32, %c0_i32_0 : i32, i32
  }
  func.func @transform_3(%arg0: i32) -> (i32, i32) {
    %c0_i32 = arith.constant 0 : i32
    %c0_i32_0 = arith.constant 0 : i32
    %c0_i32_1 = arith.constant 0 : i32
    return %c0_i32, %c0_i32_0 : i32, i32
  }
  func.func @transform_4(%arg0: i32) -> (i32, i32) {
    %c0_i32 = arith.constant 0 : i32
    %c0_i32_0 = arith.constant 0 : i32
    %c0_i32_1 = arith.constant 0 : i32
    return %c0_i32, %c0_i32_0 : i32, i32
  }
  func.func @transform_5(%arg0: i32) -> (i32, i32) {
    %c0_i32 = arith.constant 0 : i32
    %c0_i32_0 = arith.constant 0 : i32
    return %arg0, %c0_i32 : i32, i32
  }
}

</mosaic_0001>

<bundles_post_ra>
// kernel: tpu_custom_call.1
= control target key start
LH: loop header
LB: loop body
LE: loop exit
PB: predicated region body
PF: predicated region fallthrough
CT: control target
= control target key end

     0   :  { %s1588_s18 = smov 0   ;;  %s2110_s0 = inlined_call_operand.vmem [shape: f32[1024,32], index: 0, kind: input, shape index: {}]   ;;  %s2111_s1 = inlined_call_operand.vmem [shape: f32[32,64], index: 1, kind: input, shape index: {}]   ;;  %s2112_s2 = inlined_call_operand.vmem [shape: f32[1,64], index: 2, kind: input, shape index: {}]   ;;  %s2113_s3 = inlined_call_operand.vmem [shape: f32[64,16], index: 3, kind: input, shape index: {}]   ;;  %s2114_s4 = inlined_call_operand.vmem [shape: f32[1,16], index: 4, kind: input, shape index: {}]   ;;  %s2115_s5 = inlined_call_operand.vmem [shape: f32[1024,16], index: 5, kind: output, shape index: {}]  }
   0x1 LB: > { %s1337_s19 = sadd.s32 4294967295, %s1556_s18   ;;  %p1341_p0 = scmp.ge.s32.totalorder %s1556_s18, 1  ;;  %s1556_s18 = sphi %s1588_s18, %s15_s18  }
   0x2   : > { %p188_p1 = scmp.lt.s32.totalorder %s1556_s18, 3 }
   0x4   : > { %p189_p2 = pnand %p1341_p0, %p188_p1 }
   0x5   : > { %s1342_s24 = sshll.u32 (!%p189_p2), %s1337_s19, 6 }
   0x6   : > { %192 = sbr.rel (%p189_p2) target bundleno = 538 (0x21a), region = 40  ;;  %p217_p3 = scmp.lt.s32.totalorder (!%p189_p2), %s1342_s24, 127 }
   0xb   : > { %v231_v0 = vld [vmem:[%s2111_s1 + $0x18] sm:$0xff]  ;;  %v230_v1 = vld [vmem:[%s2111_s1 + $0x10] sm:$0xff]  ;;  %v229_v2 = vld [vmem:[%s2111_s1 + $0x8] sm:$0xff]  ;;  %s2117_s24 = smov (!%p217_p3, %s1342_s24), 127  ;;  %vm277_vm0 = vcmask 261120   ;;  %vm522_vm1 = vcmask 523264  }
   0xc   : > { %906 = vmatpush.msra.mxu2 %v231_v0  ;;  %386 = vmatpush.msra.mxu0 %v231_v0  ;;  %v228_v3 = vld [vmem:[%s2111_s1] sm:$0xff]  ;;  %s1343_s29 = sshll.u32 %s2117_s24, 3  ;;  %v240_v28 = vld [vmem:[%s2113_s3 + $0x38] sm:$0xff]  ;;  %v239_v29 = vld [vmem:[%s2113_s3 + $0x30] sm:$0xff]  ;;  %vm732_vm2 = vcmask 130048  }
   0xd   : > { %s1616_s7 = scalar_lea.vmem %s2110_s0, %s1343_s29  ;;  %1143 = vmatpush.msra.mxu3 %v240_v28  ;;  %627 = vmatpush.msra.mxu1 %v240_v28  ;;  %v238_v30 = vld [vmem:[%s2113_s3 + $0x28] sm:$0xff]  ;;  %v237_v31 = vld [vmem:[%s2113_s3 + $0x20] sm:$0xff]  ;;  %v236_v34 = vld [vmem:[%s2113_s3 + $0x18] sm:$0xff]  ;;  %s1849_s8 = scalar_lea.vmem %s2115_s5, %s1343_s29 }
   0xe   : > { %907 = vmatpush.msra.mxu2 %v230_v1  ;;  %387 = vmatpush.msra.mxu0 %v230_v1  ;;  %v1410_v4 = vld [vmem:[%s1616_s7 + $0x100] sm:$0xff]  ;;  %v1411_v6 = vld [vmem:[%s1616_s7 + $0x108] sm:$0xff]  ;;  %v1412_v8 = vld [vmem:[%s1616_s7 + $0x110] sm:$0xff] }
   0xf   : > { %v242_v5 = vld [vmem:[%s1616_s7] sm:$0xff]  ;;  %v243_v7 = vld [vmem:[%s1616_s7 + $0x8] sm:$0xff]  ;;  %v244_v9 = vld [vmem:[%s1616_s7 + $0x10] sm:$0xff]  ;;  %1144 = vmatpush.msra.mxu3 %v239_v29  ;;  %628 = vmatpush.msra.mxu1 %v239_v29 }
  0x10   : > { %908 = vmatpush.msra.mxu2 %v229_v2  ;;  %388 = vmatpush.msra.mxu0 %v229_v2  ;;  %v1413_v10 = vld [vmem:[%s1616_s7 + $0x118] sm:$0xff]  ;;  %v1414_v12 = vld [vmem:[%s1616_s7 + $0x120] sm:$0xff]  ;;  %v1415_v14 = vld [vmem:[%s1616_s7 + $0x128] sm:$0xff] }
  0x11   : > { %v245_v11 = vld [vmem:[%s1616_s7 + $0x18] sm:$0xff]  ;;  %v246_v13 = vld [vmem:[%s1616_s7 + $0x20] sm:$0xff]  ;;  %v247_v15 = vld [vmem:[%s1616_s7 + $0x28] sm:$0xff]  ;;  %1145 = vmatpush.msra.mxu3 %v238_v30  ;;  %629 = vmatpush.msra.mxu1 %v238_v30 }
  0x12   : > { %909 = vmatpush.msra.mxu2 %v228_v3  ;;  %389 = vmatpush.msra.mxu0 %v228_v3  ;;  %v1416_v16 = vld [vmem:[%s1616_s7 + $0x130] sm:$0xff]  ;;  %v1417_v18 = vld [vmem:[%s1616_s7 + $0x138] sm:$0xff]  ;;  %v1418_v20 = vld [vmem:[%s1616_s7 + $0x140] sm:$0xff] }
  0x13   : > { %1442 = vmatmul.msk.f32.vlgmr.msra.gmra.mxu2 %vm277_vm0, %v1410_v4  ;;  %1346 = vmatmul.msk.f32.vlgmr.msra.gmra.mxu0 %vm277_vm0, %v242_v5  ;;  %v248_v17 = vld [vmem:[%s1616_s7 + $0x30] sm:$0xff]  ;;  %v249_v19 = vld [vmem:[%s1616_s7 + $0x38] sm:$0xff]  ;;  %v250_v21 = vld [vmem:[%s1616_s7 + $0x40] sm:$0xff] }
  0x14   : > { %v1419_v22 = vld [vmem:[%s1616_s7 + $0x148] sm:$0xff]  ;;  %v1420_v24 = vld [vmem:[%s1616_s7 + $0x150] sm:$0xff]  ;;  %v1421_v26 = vld [vmem:[%s1616_s7 + $0x158] sm:$0xff]  ;;  %1146 = vmatpush.msra.mxu3 %v237_v31  ;;  %630 = vmatpush.msra.mxu1 %v237_v31 }
  0x15   : > { %v251_v23 = vld [vmem:[%s1616_s7 + $0x48] sm:$0xff]  ;;  %v252_v25 = vld [vmem:[%s1616_s7 + $0x50] sm:$0xff]  ;;  %v253_v27 = vld [vmem:[%s1616_s7 + $0x58] sm:$0xff] }
  0x16   : > { %v1422_v32 = vld [vmem:[%s1616_s7 + $0x160] sm:$0xff]  ;;  %1147 = vmatpush.msra.mxu3 %v236_v34  ;;  %631 = vmatpush.msra.mxu1 %v236_v34  ;;  %v235_v35 = vld [vmem:[%s2113_s3 + $0x10] sm:$0xff]  ;;  %v234_v36 = vld [vmem:[%s2113_s3 + $0x8] sm:$0xff] }
  0x17   : > { %v254_v33 = vld [vmem:[%s1616_s7 + $0x60] sm:$0xff]  ;;  %v1423_v37 = vld [vmem:[%s1616_s7 + $0x168] sm:$0xff]  ;;  %v1424_v40 = vld [vmem:[%s1616_s7 + $0x170] sm:$0xff] }
  0x18   : > { %1148 = vmatpush.msra.mxu3 %v235_v35  ;;  %632 = vmatpush.msra.mxu1 %v235_v35  ;;  %v255_v38 = vld [vmem:[%s1616_s7 + $0x68] sm:$0xff]  ;;  %v233_v39 = vld [vmem:[%s2113_s3] sm:$0xff]  ;;  %v256_v41 = vld [vmem:[%s1616_s7 + $0x70] sm:$0xff] }
  0x19   : > { %v1425_v42 = vld [vmem:[%s1616_s7 + $0x178] sm:$0xff]  ;;  %v1709_v44 = vld [vmem:[%s2112_s2] ss:$0 sm:$0xff]  ;;  %v1427_v52 = vld [vmem:[%s1616_s7 + $0x188] sm:$0xff] }
  0x1a   : > { %1149 = vmatpush.msra.mxu3 %v234_v36  ;;  %633 = vmatpush.msra.mxu1 %v234_v36  ;;  %v257_v43 = vld [vmem:[%s1616_s7 + $0x78] sm:$0xff]  ;;  %v1426_v45 = vld [vmem:[%s1616_s7 + $0x180] sm:$0xff]  ;;  %v259_v56 = vld [vmem:[%s1616_s7 + $0x88] sm:$0xff] }
  0x1b   : > { %1443 = vmatmul.msk.f32.gmra.mxu2 %vm277_vm0, %v1411_v6  ;;  %1347 = vmatmul.msk.f32.gmra.mxu0 %vm277_vm0, %v243_v7  ;;  %v258_v47 = vld [vmem:[%s1616_s7 + $0x80] sm:$0xff]  ;;  %v1428_v60 = vld [vmem:[%s1616_s7 + $0x190] sm:$0xff]  ;;  %v1429_v4 = vld [vmem:[%s1616_s7 + $0x198] sm:$0xff] }
  0x1c   : > { %1150 = vmatpush.msra.mxu3 %v233_v39  ;;  %634 = vmatpush.msra.mxu1 %v233_v39  ;;  %v260_v0 = vld [vmem:[%s1616_s7 + $0x90] sm:$0xff]  ;;  %v1433_v36 = vld [vmem:[%s1616_s7 + $0x1b8] sm:$0xff] }
  0x1d   : > { %v1432_v28 = vld [vmem:[%s1616_s7 + $0x1b0] sm:$0xff] }
  0x23   : > { %1444 = vmatmul.msk.f32.gmra.mxu2 %vm277_vm0, %v1412_v8  ;;  %1348 = vmatmul.msk.f32.gmra.mxu0 %vm277_vm0, %v244_v9  ;;  %v261_v8 = vld [vmem:[%s1616_s7 + $0x98] sm:$0xff] }
  0x2b   : > { %1445 = vmatmul.msk.f32.gmra.mxu2 %vm277_vm0, %v1413_v10  ;;  %1349 = vmatmul.msk.f32.gmra.mxu0 %vm277_vm0, %v245_v11 }
  0x33   : > { %1446 = vmatmul.msk.f32.gmra.mxu2 %vm277_vm0, %v1414_v12  ;;  %1350 = vmatmul.msk.f32.gmra.mxu0 %vm277_vm0, %v246_v13  ;;  %v1430_v12 = vld [vmem:[%s1616_s7 + $0x1a0] sm:$0xff] }
  0x3b   : > { %1447 = vmatmul.msk.f32.gmra.mxu2 %vm277_vm0, %v1415_v14  ;;  %1351 = vmatmul.msk.f32.gmra.mxu0 %vm277_vm0, %v247_v15 }
  0x43   : > { %1448 = vmatmul.msk.f32.gmra.mxu2 %vm277_vm0, %v1416_v16  ;;  %1352 = vmatmul.msk.f32.gmra.mxu0 %vm277_vm0, %v248_v17  ;;  %v262_v16 = vld [vmem:[%s1616_s7 + $0xa0] sm:$0xff] }
  0x4b   : > { %1449 = vmatmul.msk.f32.gmra.mxu2 %vm277_vm0, %v1417_v18  ;;  %1353 = vmatmul.msk.f32.gmra.mxu0 %vm277_vm0, %v249_v19 }
  0x53   : > { %1450 = vmatmul.msk.f32.gmra.mxu2 %vm277_vm0, %v1418_v20  ;;  %1354 = vmatmul.msk.f32.gmra.mxu0 %vm277_vm0, %v250_v21  ;;  %v1431_v20 = vld [vmem:[%s1616_s7 + $0x1a8] sm:$0xff] }
  0x5b   : > { %1451 = vmatmul.msk.f32.gmra.mxu2 %vm277_vm0, %v1419_v22  ;;  %1355 = vmatmul.msk.f32.gmra.mxu0 %vm277_vm0, %v251_v23 }
  0x63   : > { %1452 = vmatmul.msk.f32.gmra.mxu2 %vm277_vm0, %v1420_v24  ;;  %1356 = vmatmul.msk.f32.gmra.mxu0 %vm277_vm0, %v252_v25  ;;  %v263_v24 = vld [vmem:[%s1616_s7 + $0xa8] sm:$0xff] }
  0x6b   : > { %1453 = vmatmul.msk.f32.gmra.mxu2 %vm277_vm0, %v1421_v26  ;;  %1357 = vmatmul.msk.f32.gmra.mxu0 %vm277_vm0, %v253_v27 }
  0x73   : > { %1454 = vmatmul.msk.f32.gmra.mxu2 %vm277_vm0, %v1422_v32  ;;  %1358 = vmatmul.msk.f32.gmra.mxu0 %vm277_vm0, %v254_v33  ;;  %v264_v32 = vld [vmem:[%s1616_s7 + $0xb0] sm:$0xff] }
  0x7b   : > { %1455 = vmatmul.msk.f32.gmra.mxu2 %vm277_vm0, %v1423_v37  ;;  %1359 = vmatmul.msk.f32.gmra.mxu0 %vm277_vm0, %v255_v38 }
  0x83   : > { %1456 = vmatmul.msk.f32.gmra.mxu2 %vm277_vm0, %v1424_v40  ;;  %1360 = vmatmul.msk.f32.gmra.mxu0 %vm277_vm0, %v256_v41  ;;  %v265_v40 = vld [vmem:[%s1616_s7 + $0xb8] sm:$0xff] }
  0x8b   : > { %1457 = vmatmul.msk.f32.gmra.mxu2 %vm277_vm0, %v1425_v42  ;;  %1361 = vmatmul.msk.f32.gmra.mxu0 %vm277_vm0, %v257_v43 }
  0x90   : > { %v391_v46 = vpop.f32.mrf.mxu0 }
  0x91   : > { %v392_v48 = vadd.f32 %v1709_v44, %v391_v46 }
  0x93   : > { %1458 = vmatmul.msk.f32.gmra.mxu2 %vm277_vm0, %v1426_v45  ;;  %v487_v49 = vmax.f32 %v392_v48, 0.0  ;;  %1362 = vmatmul.msk.f32.gmra.mxu0 %vm277_vm0, %v258_v47  ;;  %v1434_v45 = vld [vmem:[%s1616_s7 + $0x1c0] sm:$0xff] }
  0x95   : > { %1378 = vmatmul.msk.f32.vlgmr.msra.gmra.mxu1 %vm522_vm1, %v487_v49  ;;  %v266_v49 = vld [vmem:[%s1616_s7 + $0xc0] sm:$0xff] }
  0x96   : > { %v911_v50 = vpop.f32.mrf.mxu2 }
  0x97   : > { %v912_v51 = vadd.f32 %v1709_v44, %v911_v50 }
  0x98   : > { %v394_v53 = vpop.f32.mrf.mxu0 }
  0x99   : > { %v1007_v54 = vmax.f32 %v912_v51, 0.0  ;;  %v395_v55 = vadd.f32 %v1709_v44, %v394_v53  ;;  %v1435_v53 = vld [vmem:[%s1616_s7 + $0x1c8] sm:$0xff] }
  0x9b   : > { %1459 = vmatmul.msk.f32.gmra.mxu2 %vm277_vm0, %v1427_v52  ;;  %1474 = vmatmul.msk.f32.vlgmr.msra.gmra.mxu3 %vm522_vm1, %v1007_v54  ;;  %v488_v57 = vmax.f32 %v395_v55, 0.0 }
  0x9c   : > { %1363 = vmatmul.msk.f32.gmra.mxu0 %vm277_vm0, %v259_v56 }
  0x9d   : > { %1379 = vmatmul.msk.f32.gmra.mxu1 %vm522_vm1, %v488_v57  ;;  %v267_v57 = vld [vmem:[%s1616_s7 + $0xc8] sm:$0xff] }
  0x9e   : > { %v914_v58 = vpop.f32.mrf.mxu2 }
  0x9f   : > { %v915_v59 = vadd.f32 %v1709_v44, %v914_v58 }
  0xa0   : > { %v397_v61 = vpop.f32.mrf.mxu0 }
  0xa1   : > { %v1008_v62 = vmax.f32 %v915_v59, 0.0  ;;  %v398_v63 = vadd.f32 %v1709_v44, %v397_v61  ;;  %v1436_v61 = vld [vmem:[%s1616_s7 + $0x1d0] sm:$0xff] }
  0xa3   : > { %1460 = vmatmul.msk.f32.gmra.mxu2 %vm277_vm0, %v1428_v60  ;;  %1475 = vmatmul.msk.f32.gmra.mxu3 %vm522_vm1, %v1008_v62  ;;  %v489_v1 = vmax.f32 %v398_v63, 0.0 }
  0xa4   : > { %1364 = vmatmul.msk.f32.gmra.mxu0 %vm277_vm0, %v260_v0 }
  0xa5   : > { %1380 = vmatmul.msk.f32.gmra.mxu1 %vm522_vm1, %v489_v1  ;;  %v268_v1 = vld [vmem:[%s1616_s7 + $0xd0] sm:$0xff] }
  0xa6   : > { %v917_v2 = vpop.f32.mrf.mxu2 }
  0xa7   : > { %v918_v3 = vadd.f32 %v1709_v44, %v917_v2 }
  0xa8   : > { %v400_v5 = vpop.f32.mrf.mxu0 }
  0xa9   : > { %v1009_v6 = vmax.f32 %v918_v3, 0.0  ;;  %v401_v7 = vadd.f32 %v1709_v44, %v400_v5  ;;  %v1437_v5 = vld [vmem:[%s1616_s7 + $0x1d8] sm:$0xff] }
  0xab   : > { %1461 = vmatmul.msk.f32.gmra.mxu2 %vm277_vm0, %v1429_v4  ;;  %1476 = vmatmul.msk.f32.gmra.mxu3 %vm522_vm1, %v1009_v6  ;;  %v490_v9 = vmax.f32 %v401_v7, 0.0 }
  0xac   : > { %1365 = vmatmul.msk.f32.gmra.mxu0 %vm277_vm0, %v261_v8 }
  0xad   : > { %1381 = vmatmul.msk.f32.gmra.mxu1 %vm522_vm1, %v490_v9  ;;  %v269_v9 = vld [vmem:[%s1616_s7 + $0xd8] sm:$0xff] }
  0xae   : > { %v920_v10 = vpop.f32.mrf.mxu2 }
  0xaf   : > { %v921_v11 = vadd.f32 %v1709_v44, %v920_v10 }
  0xb0   : > { %v403_v13 = vpop.f32.mrf.mxu0 }
  0xb1   : > { %v1010_v14 = vmax.f32 %v921_v11, 0.0  ;;  %v404_v15 = vadd.f32 %v1709_v44, %v403_v13  ;;  %v1438_v13 = vld [vmem:[%s1616_s7 + $0x1e0] sm:$0xff] }
  0xb3   : > { %1462 = vmatmul.msk.f32.gmra.mxu2 %vm277_vm0, %v1430_v12  ;;  %1477 = vmatmul.msk.f32.gmra.mxu3 %vm522_vm1, %v1010_v14  ;;  %v491_v17 = vmax.f32 %v404_v15, 0.0 }
  0xb4   : > { %1366 = vmatmul.msk.f32.gmra.mxu0 %vm277_vm0, %v262_v16 }
  0xb5   : > { %1382 = vmatmul.msk.f32.gmra.mxu1 %vm522_vm1, %v491_v17  ;;  %v270_v17 = vld [vmem:[%s1616_s7 + $0xe0] sm:$0xff] }
  0xb6   : > { %v923_v18 = vpop.f32.mrf.mxu2 }
  0xb7   : > { %v924_v19 = vadd.f32 %v1709_v44, %v923_v18 }
  0xb8   : > { %v406_v21 = vpop.f32.mrf.mxu0 }
  0xb9   : > { %v1011_v22 = vmax.f32 %v924_v19, 0.0  ;;  %v407_v23 = vadd.f32 %v1709_v44, %v406_v21  ;;  %v1439_v21 = vld [vmem:[%s1616_s7 + $0x1e8] sm:$0xff] }
  0xbb   : > { %1463 = vmatmul.msk.f32.gmra.mxu2 %vm277_vm0, %v1431_v20  ;;  %1478 = vmatmul.msk.f32.gmra.mxu3 %vm522_vm1, %v1011_v22  ;;  %v492_v25 = vmax.f32 %v407_v23, 0.0 }
  0xbc   : > { %1367 = vmatmul.msk.f32.gmra.mxu0 %vm277_vm0, %v263_v24 }
  0xbd   : > { %1383 = vmatmul.msk.f32.gmra.mxu1 %vm522_vm1, %v492_v25  ;;  %v271_v25 = vld [vmem:[%s1616_s7 + $0xe8] sm:$0xff] }
  0xbe   : > { %v926_v26 = vpop.f32.mrf.mxu2 }
  0xbf   : > { %v927_v27 = vadd.f32 %v1709_v44, %v926_v26 }
  0xc0   : > { %v409_v29 = vpop.f32.mrf.mxu0 }
  0xc1   : > { %v1012_v30 = vmax.f32 %v927_v27, 0.0  ;;  %v410_v31 = vadd.f32 %v1709_v44, %v409_v29  ;;  %v1440_v29 = vld [vmem:[%s1616_s7 + $0x1f0] sm:$0xff] }
  0xc3   : > { %1464 = vmatmul.msk.f32.gmra.mxu2 %vm277_vm0, %v1432_v28  ;;  %1479 = vmatmul.msk.f32.gmra.mxu3 %vm522_vm1, %v1012_v30  ;;  %v493_v33 = vmax.f32 %v410_v31, 0.0 }
  0xc4   : > { %1368 = vmatmul.msk.f32.gmra.mxu0 %vm277_vm0, %v264_v32 }
  0xc5   : > { %1384 = vmatmul.msk.f32.gmra.mxu1 %vm522_vm1, %v493_v33  ;;  %v272_v33 = vld [vmem:[%s1616_s7 + $0xf0] sm:$0xff] }
  0xc6   : > { %v929_v34 = vpop.f32.mrf.mxu2 }
  0xc7   : > { %v930_v35 = vadd.f32 %v1709_v44, %v929_v34 }
  0xc8   : > { %v412_v37 = vpop.f32.mrf.mxu0 }
  0xc9   : > { %v1013_v38 = vmax.f32 %v930_v35, 0.0  ;;  %v413_v39 = vadd.f32 %v1709_v44, %v412_v37  ;;  %v1441_v37 = vld [vmem:[%s1616_s7 + $0x1f8] sm:$0xff] }
  0xcb   : > { %1465 = vmatmul.msk.f32.gmra.mxu2 %vm277_vm0, %v1433_v36  ;;  %1480 = vmatmul.msk.f32.gmra.mxu3 %vm522_vm1, %v1013_v38  ;;  %v494_v41 = vmax.f32 %v413_v39, 0.0 }
  0xcc   : > { %1369 = vmatmul.msk.f32.gmra.mxu0 %vm277_vm0, %v265_v40 }
  0xcd   : > { %1385 = vmatmul.msk.f32.gmra.mxu1 %vm522_vm1, %v494_v41  ;;  %v273_v41 = vld [vmem:[%s1616_s7 + $0xf8] sm:$0xff] }
  0xce   : > { %v932_v42 = vpop.f32.mrf.mxu2 }
  0xcf   : > { %v933_v43 = vadd.f32 %v1709_v44, %v932_v42 }
  0xd0   : > { %v415_v46 = vpop.f32.mrf.mxu0 }
  0xd1   : > { %v1014_v47 = vmax.f32 %v933_v43, 0.0  ;;  %v416_v48 = vadd.f32 %v1709_v44, %v415_v46  ;;  %v1841_v46 = vld [vmem:[%s2114_s4] ss:$0 sm:$0xff] }
  0xd3   : > { %1466 = vmatmul.msk.f32.gmra.mxu2 %vm277_vm0, %v1434_v45  ;;  %1481 = vmatmul.msk.f32.gmra.mxu3 %vm522_vm1, %v1014_v47  ;;  %v495_v50 = vmax.f32 %v416_v48, 0.0 }
  0xd4   : > { %1370 = vmatmul.msk.f32.gmra.mxu0 %vm277_vm0, %v266_v49 }
  0xd5   : > { %1386 = vmatmul.msk.f32.gmra.mxu1 %vm522_vm1, %v495_v50 }
  0xd6   : > { %v935_v51 = vpop.f32.mrf.mxu2 }
  0xd7   : > { %v936_v52 = vadd.f32 %v1709_v44, %v935_v51 }
  0xd8   : > { %v418_v54 = vpop.f32.mrf.mxu0 }
  0xd9   : > { %v1015_v55 = vmax.f32 %v936_v52, 0.0  ;;  %v419_v56 = vadd.f32 %v1709_v44, %v418_v54 }
  0xdb   : > { %1467 = vmatmul.msk.f32.gmra.mxu2 %vm277_vm0, %v1435_v53  ;;  %1482 = vmatmul.msk.f32.gmra.mxu3 %vm522_vm1, %v1015_v55  ;;  %v496_v58 = vmax.f32 %v419_v56, 0.0 }
  0xdc   : > { %1371 = vmatmul.msk.f32.gmra.mxu0 %vm277_vm0, %v267_v57 }
  0xdd   : > { %1387 = vmatmul.msk.f32.gmra.mxu1 %vm522_vm1, %v496_v58 }
  0xde   : > { %v938_v59 = vpop.f32.mrf.mxu2 }
  0xdf   : > { %v939_v60 = vadd.f32 %v1709_v44, %v938_v59 }
  0xe0   : > { %v421_v62 = vpop.f32.mrf.mxu0 }
  0xe1   : > { %v1016_v63 = vmax.f32 %v939_v60, 0.0  ;;  %v422_v0 = vadd.f32 %v1709_v44, %v421_v62 }
  0xe3   : > { %1468 = vmatmul.msk.f32.gmra.mxu2 %vm277_vm0, %v1436_v61  ;;  %1483 = vmatmul.msk.f32.gmra.mxu3 %vm522_vm1, %v1016_v63  ;;  %v497_v2 = vmax.f32 %v422_v0, 0.0 }
  0xe4   : > { %1372 = vmatmul.msk.f32.gmra.mxu0 %vm277_vm0, %v268_v1 }
  0xe5   : > { %1388 = vmatmul.msk.f32.gmra.mxu1 %vm522_vm1, %v497_v2 }
  0xe6   : > { %v941_v3 = vpop.f32.mrf.mxu2 }
  0xe7   : > { %v942_v4 = vadd.f32 %v1709_v44, %v941_v3 }
  0xe8   : > { %v424_v6 = vpop.f32.mrf.mxu0 }
  0xe9   : > { %v1017_v7 = vmax.f32 %v942_v4, 0.0  ;;  %v425_v8 = vadd.f32 %v1709_v44, %v424_v6 }
  0xeb   : > { %1469 = vmatmul.msk.f32.gmra.mxu2 %vm277_vm0, %v1437_v5  ;;  %1484 = vmatmul.msk.f32.gmra.mxu3 %vm522_vm1, %v1017_v7  ;;  %v498_v10 = vmax.f32 %v425_v8, 0.0 }
  0xec   : > { %1373 = vmatmul.msk.f32.gmra.mxu0 %vm277_vm0, %v269_v9 }
  0xed   : > { %1389 = vmatmul.msk.f32.gmra.mxu1 %vm522_vm1, %v498_v10 }
  0xee   : > { %v944_v11 = vpop.f32.mrf.mxu2 }
  0xef   : > { %v945_v12 = vadd.f32 %v1709_v44, %v944_v11 }
  0xf0   : > { %v427_v14 = vpop.f32.mrf.mxu0 }
  0xf1   : > { %v1018_v15 = vmax.f32 %v945_v12, 0.0  ;;  %v428_v16 = vadd.f32 %v1709_v44, %v427_v14 }
  0xf3   : > { %1470 = vmatmul.msk.f32.gmra.mxu2 %vm277_vm0, %v1438_v13  ;;  %1485 = vmatmul.msk.f32.gmra.mxu3 %vm522_vm1, %v1018_v15  ;;  %v499_v18 = vmax.f32 %v428_v16, 0.0 }
  0xf4   : > { %1374 = vmatmul.msk.f32.gmra.mxu0 %vm277_vm0, %v270_v17 }
  0xf5   : > { %1390 = vmatmul.msk.f32.gmra.mxu1 %vm522_vm1, %v499_v18 }
  0xf6   : > { %v947_v19 = vpop.f32.mrf.mxu2 }
  0xf7   : > { %v948_v20 = vadd.f32 %v1709_v44, %v947_v19 }
  0xf8   : > { %v430_v22 = vpop.f32.mrf.mxu0 }
  0xf9   : > { %v1019_v23 = vmax.f32 %v948_v20, 0.0  ;;  %v431_v24 = vadd.f32 %v1709_v44, %v430_v22 }
  0xfb   : > { %1471 = vmatmul.msk.f32.gmra.mxu2 %vm277_vm0, %v1439_v21  ;;  %1486 = vmatmul.msk.f32.gmra.mxu3 %vm522_vm1, %v1019_v23  ;;  %v500_v26 = vmax.f32 %v431_v24, 0.0 }
  0xfc   : > { %1375 = vmatmul.msk.f32.gmra.mxu0 %vm277_vm0, %v271_v25 }
  0xfd   : > { %1391 = vmatmul.msk.f32.gmra.mxu1 %vm522_vm1, %v500_v26 }
  0xfe   : > { %v950_v27 = vpop.f32.mrf.mxu2 }
  0xff   : > { %v951_v28 = vadd.f32 %v1709_v44, %v950_v27 }
 0x100   : > { %v433_v30 = vpop.f32.mrf.mxu0 }
 0x101   : > { %v1020_v31 = vmax.f32 %v951_v28, 0.0  ;;  %v434_v32 = vadd.f32 %v1709_v44, %v433_v30 }
 0x103   : > { %1472 = vmatmul.msk.f32.gmra.mxu2 %vm277_vm0, %v1440_v29  ;;  %1487 = vmatmul.msk.f32.gmra.mxu3 %vm522_vm1, %v1020_v31  ;;  %v501_v34 = vmax.f32 %v434_v32, 0.0 }
 0x104   : > { %1376 = vmatmul.msk.f32.gmra.mxu0 %vm277_vm0, %v272_v33 }
 0x105   : > { %1392 = vmatmul.msk.f32.gmra.mxu1 %vm522_vm1, %v501_v34 }
 0x106   : > { %v953_v35 = vpop.f32.mrf.mxu2 }
 0x107   : > { %v954_v36 = vadd.f32 %v1709_v44, %v953_v35 }
 0x108   : > { %v436_v38 = vpop.f32.mrf.mxu0 }
 0x109   : > { %v1021_v39 = vmax.f32 %v954_v36, 0.0  ;;  %v437_v40 = vadd.f32 %v1709_v44, %v436_v38 }
 0x10b   : > { %1473 = vmatmul.msk.f32.gmra.mxu2 %vm277_vm0, %v1441_v37  ;;  %1488 = vmatmul.msk.f32.gmra.mxu3 %vm522_vm1, %v1021_v39  ;;  %v502_v42 = vmax.f32 %v437_v40, 0.0 }
 0x10c   : > { %1377 = vmatmul.msk.f32.gmra.mxu0 %vm277_vm0, %v273_v41 }
 0x10d   : > { %1393 = vmatmul.msk.f32.gmra.mxu1 %vm522_vm1, %v502_v42 }
 0x10e   : > { %v956_v43 = vpop.f32.mrf.mxu2 }
 0x10f   : > { %v957_v45 = vadd.f32 %v1709_v44, %v956_v43 }
 0x110   : > { %v439_v47 = vpop.f32.mrf.mxu0 }
 0x111   : > { %v1022_v48 = vmax.f32 %v957_v45, 0.0  ;;  %v440_v49 = vadd.f32 %v1709_v44, %v439_v47 }
 0x112   : > { %v636_v50 = vpop.f32.mrf.mxu1 }
 0x113   : > { %1489 = vmatmul.msk.f32.gmra.mxu3 %vm522_vm1, %v1022_v48  ;;  %v503_v51 = vmax.f32 %v440_v49, 0.0  ;;  %v637_v52 = vadd.f32 %v1841_v46, %v636_v50 }
 0x115   : > { %733 = vst.msk [vmem:[%s1849_s8] sm:$0xff] %vm732_vm2, %v637_v52  ;;  %1394 = vmatmul.msk.f32.gmra.mxu1 %vm522_vm1, %v503_v51 }
 0x116   : > { %v959_v53 = vpop.f32.mrf.mxu2 }
 0x117   : > { %v960_v54 = vadd.f32 %v1709_v44, %v959_v53 }
 0x119   : > { %v1023_v55 = vmax.f32 %v960_v54, 0.0  ;;  %v442_v56 = vpop.f32.mrf.mxu0 }
 0x11a   : > { %v443_v57 = vadd.f32 %v1709_v44, %v442_v56  ;;  %v639_v58 = vpop.f32.mrf.mxu1 }
 0x11b   : > { %1490 = vmatmul.msk.f32.gmra.mxu3 %vm522_vm1, %v1023_v55  ;;  %v640_v59 = vadd.f32 %v1841_v46, %v639_v58 }
 0x11c   : > { %v504_v60 = vmax.f32 %v443_v57, 0.0 }
 0x11d   : > { %734 = vst.msk [vmem:[%s1849_s8 + $0x8] sm:$0xff] %vm732_vm2, %v640_v59 }
 0x11e   : > { %v962_v61 = vpop.f32.mrf.mxu2  ;;  %v1152_v62 = vpop.f32.mrf.mxu3  ;;  %1395 = vmatmul.msk.f32.gmra.mxu1 %vm522_vm1, %v504_v60 }
 0x11f   : > { %v963_v63 = vadd.f32 %v1709_v44, %v962_v61  ;;  %v1153_v0 = vadd.f32 %v1841_v46, %v1152_v62 }
 0x121   : > { %v1024_v1 = vmax.f32 %v963_v63, 0.0  ;;  %1506 = vst.msk [vmem:[%s1849_s8 + $0x100] sm:$0xff] %vm732_vm2, %v1153_v0  ;;  %v445_v2 = vpop.f32.mrf.mxu0 }
 0x122   : > { %v446_v3 = vadd.f32 %v1709_v44, %v445_v2  ;;  %v642_v4 = vpop.f32.mrf.mxu1 }
 0x123   : > { %1491 = vmatmul.msk.f32.gmra.mxu3 %vm522_vm1, %v1024_v1  ;;  %v643_v5 = vadd.f32 %v1841_v46, %v642_v4 }
 0x124   : > { %v505_v6 = vmax.f32 %v446_v3, 0.0 }
 0x125   : > { %735 = vst.msk [vmem:[%s1849_s8 + $0x10] sm:$0xff] %vm732_vm2, %v643_v5 }
 0x126   : > { %v965_v7 = vpop.f32.mrf.mxu2  ;;  %v1155_v8 = vpop.f32.mrf.mxu3  ;;  %1396 = vmatmul.msk.f32.gmra.mxu1 %vm522_vm1, %v505_v6 }
 0x127   : > { %v966_v9 = vadd.f32 %v1709_v44, %v965_v7  ;;  %v1156_v10 = vadd.f32 %v1841_v46, %v1155_v8 }
 0x129   : > { %v1025_v11 = vmax.f32 %v966_v9, 0.0  ;;  %1507 = vst.msk [vmem:[%s1849_s8 + $0x108] sm:$0xff] %vm732_vm2, %v1156_v10  ;;  %v448_v12 = vpop.f32.mrf.mxu0 }
 0x12a   : > { %v449_v13 = vadd.f32 %v1709_v44, %v448_v12  ;;  %v645_v14 = vpop.f32.mrf.mxu1 }
 0x12b   : > { %1492 = vmatmul.msk.f32.gmra.mxu3 %vm522_vm1, %v1025_v11  ;;  %v646_v15 = vadd.f32 %v1841_v46, %v645_v14 }
 0x12c   : > { %v506_v16 = vmax.f32 %v449_v13, 0.0 }
 0x12d   : > { %736 = vst.msk [vmem:[%s1849_s8 + $0x18] sm:$0xff] %vm732_vm2, %v646_v15 }
 0x12e   : > { %v968_v17 = vpop.f32.mrf.mxu2  ;;  %v1158_v18 = vpop.f32.mrf.mxu3  ;;  %1397 = vmatmul.msk.f32.gmra.mxu1 %vm522_vm1, %v506_v16 }
 0x12f   : > { %v969_v19 = vadd.f32 %v1709_v44, %v968_v17  ;;  %v1159_v20 = vadd.f32 %v1841_v46, %v1158_v18 }
 0x131   : > { %v1026_v21 = vmax.f32 %v969_v19, 0.0  ;;  %1508 = vst.msk [vmem:[%s1849_s8 + $0x110] sm:$0xff] %vm732_vm2, %v1159_v20  ;;  %v451_v22 = vpop.f32.mrf.mxu0 }
 0x132   : > { %v452_v23 = vadd.f32 %v1709_v44, %v451_v22  ;;  %v648_v24 = vpop.f32.mrf.mxu1 }
 0x133   : > { %1493 = vmatmul.msk.f32.gmra.mxu3 %vm522_vm1, %v1026_v21  ;;  %v649_v25 = vadd.f32 %v1841_v46, %v648_v24 }
 0x134   : > { %v507_v26 = vmax.f32 %v452_v23, 0.0 }
 0x135   : > { %737 = vst.msk [vmem:[%s1849_s8 + $0x20] sm:$0xff] %vm732_vm2, %v649_v25 }
 0x136   : > { %v971_v27 = vpop.f32.mrf.mxu2  ;;  %v1161_v28 = vpop.f32.mrf.mxu3  ;;  %1398 = vmatmul.msk.f32.gmra.mxu1 %vm522_vm1, %v507_v26 }
 0x137   : > { %v972_v29 = vadd.f32 %v1709_v44, %v971_v27  ;;  %v1162_v30 = vadd.f32 %v1841_v46, %v1161_v28 }
 0x139   : > { %v1027_v31 = vmax.f32 %v972_v29, 0.0  ;;  %1509 = vst.msk [vmem:[%s1849_s8 + $0x118] sm:$0xff] %vm732_vm2, %v1162_v30  ;;  %v454_v32 = vpop.f32.mrf.mxu0 }
 0x13a   : > { %v455_v33 = vadd.f32 %v1709_v44, %v454_v32  ;;  %v651_v34 = vpop.f32.mrf.mxu1 }
 0x13b   : > { %1494 = vmatmul.msk.f32.gmra.mxu3 %vm522_vm1, %v1027_v31  ;;  %v652_v35 = vadd.f32 %v1841_v46, %v651_v34 }
 0x13c   : > { %v508_v36 = vmax.f32 %v455_v33, 0.0 }
 0x13d   : > { %738 = vst.msk [vmem:[%s1849_s8 + $0x28] sm:$0xff] %vm732_vm2, %v652_v35 }
 0x13e   : > { %v974_v37 = vpop.f32.mrf.mxu2  ;;  %v1164_v38 = vpop.f32.mrf.mxu3  ;;  %1399 = vmatmul.msk.f32.gmra.mxu1 %vm522_vm1, %v508_v36 }
 0x13f   : > { %v975_v39 = vadd.f32 %v1709_v44, %v974_v37  ;;  %v1165_v40 = vadd.f32 %v1841_v46, %v1164_v38 }
 0x141   : > { %v1028_v41 = vmax.f32 %v975_v39, 0.0  ;;  %1510 = vst.msk [vmem:[%s1849_s8 + $0x120] sm:$0xff] %vm732_vm2, %v1165_v40  ;;  %v457_v42 = vpop.f32.mrf.mxu0 }
 0x142   : > { %v458_v43 = vadd.f32 %v1709_v44, %v457_v42  ;;  %v654_v45 = vpop.f32.mrf.mxu1 }
 0x143   : > { %1495 = vmatmul.msk.f32.gmra.mxu3 %vm522_vm1, %v1028_v41  ;;  %v655_v47 = vadd.f32 %v1841_v46, %v654_v45 }
 0x144   : > { %v509_v48 = vmax.f32 %v458_v43, 0.0 }
 0x145   : > { %739 = vst.msk [vmem:[%s1849_s8 + $0x30] sm:$0xff] %vm732_vm2, %v655_v47 }
 0x146   : > { %v977_v49 = vpop.f32.mrf.mxu2  ;;  %v1167_v50 = vpop.f32.mrf.mxu3  ;;  %1400 = vmatmul.msk.f32.gmra.mxu1 %vm522_vm1, %v509_v48 }
 0x147   : > { %v978_v51 = vadd.f32 %v1709_v44, %v977_v49  ;;  %v1168_v52 = vadd.f32 %v1841_v46, %v1167_v50 }
 0x149   : > { %v1029_v53 = vmax.f32 %v978_v51, 0.0  ;;  %1511 = vst.msk [vmem:[%s1849_s8 + $0x128] sm:$0xff] %vm732_vm2, %v1168_v52  ;;  %v460_v54 = vpop.f32.mrf.mxu0 }
 0x14a   : > { %v461_v55 = vadd.f32 %v1709_v44, %v460_v54  ;;  %v657_v56 = vpop.f32.mrf.mxu1 }
 0x14b   : > { %1496 = vmatmul.msk.f32.gmra.mxu3 %vm522_vm1, %v1029_v53  ;;  %v658_v57 = vadd.f32 %v1841_v46, %v657_v56 }
 0x14c   : > { %v510_v58 = vmax.f32 %v461_v55, 0.0 }
 0x14d   : > { %740 = vst.msk [vmem:[%s1849_s8 + $0x38] sm:$0xff] %vm732_vm2, %v658_v57 }
 0x14e   : > { %v980_v59 = vpop.f32.mrf.mxu2  ;;  %v1170_v60 = vpop.f32.mrf.mxu3  ;;  %1401 = vmatmul.msk.f32.gmra.mxu1 %vm522_vm1, %v510_v58 }
 0x14f   : > { %v981_v61 = vadd.f32 %v1709_v44, %v980_v59  ;;  %v1171_v62 = vadd.f32 %v1841_v46, %v1170_v60 }
 0x151   : > { %v1030_v63 = vmax.f32 %v981_v61, 0.0  ;;  %1512 = vst.msk [vmem:[%s1849_s8 + $0x130] sm:$0xff] %vm732_vm2, %v1171_v62  ;;  %v463_v0 = vpop.f32.mrf.mxu0 }
 0x152   : > { %v464_v1 = vadd.f32 %v1709_v44, %v463_v0  ;;  %v660_v2 = vpop.f32.mrf.mxu1 }
 0x153   : > { %1497 = vmatmul.msk.f32.gmra.mxu3 %vm522_vm1, %v1030_v63  ;;  %v661_v3 = vadd.f32 %v1841_v46, %v660_v2 }
 0x154   : > { %v511_v4 = vmax.f32 %v464_v1, 0.0 }
 0x155   : > { %741 = vst.msk [vmem:[%s1849_s8 + $0x40] sm:$0xff] %vm732_vm2, %v661_v3 }
 0x156   : > { %v983_v5 = vpop.f32.mrf.mxu2  ;;  %v1173_v6 = vpop.f32.mrf.mxu3  ;;  %1402 = vmatmul.msk.f32.gmra.mxu1 %vm522_vm1, %v511_v4 }
 0x157   : > { %v984_v7 = vadd.f32 %v1709_v44, %v983_v5  ;;  %v1174_v8 = vadd.f32 %v1841_v46, %v1173_v6 }
 0x159   : > { %v1031_v9 = vmax.f32 %v984_v7, 0.0  ;;  %1513 = vst.msk [vmem:[%s1849_s8 + $0x138] sm:$0xff] %vm732_vm2, %v1174_v8  ;;  %v466_v10 = vpop.f32.mrf.mxu0 }
 0x15a   : > { %v467_v11 = vadd.f32 %v1709_v44, %v466_v10  ;;  %v663_v12 = vpop.f32.mrf.mxu1 }
 0x15b   : > { %1498 = vmatmul.msk.f32.gmra.mxu3 %vm522_vm1, %v1031_v9  ;;  %v664_v13 = vadd.f32 %v1841_v46, %v663_v12 }
 0x15c   : > { %v512_v14 = vmax.f32 %v467_v11, 0.0 }
 0x15d   : > { %742 = vst.msk [vmem:[%s1849_s8 + $0x48] sm:$0xff] %vm732_vm2, %v664_v13 }
 0x15e   : > { %v986_v15 = vpop.f32.mrf.mxu2  ;;  %v1176_v16 = vpop.f32.mrf.mxu3  ;;  %1403 = vmatmul.msk.f32.gmra.mxu1 %vm522_vm1, %v512_v14 }
 0x15f   : > { %v987_v17 = vadd.f32 %v1709_v44, %v986_v15  ;;  %v1177_v18 = vadd.f32 %v1841_v46, %v1176_v16 }
 0x161   : > { %v1032_v19 = vmax.f32 %v987_v17, 0.0  ;;  %1514 = vst.msk [vmem:[%s1849_s8 + $0x140] sm:$0xff] %vm732_vm2, %v1177_v18  ;;  %v469_v20 = vpop.f32.mrf.mxu0 }
 0x162   : > { %v470_v21 = vadd.f32 %v1709_v44, %v469_v20  ;;  %v666_v22 = vpop.f32.mrf.mxu1 }
 0x163   : > { %1499 = vmatmul.msk.f32.gmra.mxu3 %vm522_vm1, %v1032_v19  ;;  %v667_v23 = vadd.f32 %v1841_v46, %v666_v22 }
 0x164   : > { %v513_v24 = vmax.f32 %v470_v21, 0.0 }
 0x165   : > { %743 = vst.msk [vmem:[%s1849_s8 + $0x50] sm:$0xff] %vm732_vm2, %v667_v23 }
 0x166   : > { %v989_v25 = vpop.f32.mrf.mxu2  ;;  %v1179_v26 = vpop.f32.mrf.mxu3  ;;  %1404 = vmatmul.msk.f32.gmra.mxu1 %vm522_vm1, %v513_v24 }
 0x167   : > { %v990_v27 = vadd.f32 %v1709_v44, %v989_v25  ;;  %v1180_v28 = vadd.f32 %v1841_v46, %v1179_v26 }
 0x169   : > { %v1033_v29 = vmax.f32 %v990_v27, 0.0  ;;  %1515 = vst.msk [vmem:[%s1849_s8 + $0x148] sm:$0xff] %vm732_vm2, %v1180_v28  ;;  %v472_v30 = vpop.f32.mrf.mxu0 }
 0x16a   : > { %v473_v31 = vadd.f32 %v1709_v44, %v472_v30  ;;  %v669_v32 = vpop.f32.mrf.mxu1 }
 0x16b   : > { %1500 = vmatmul.msk.f32.gmra.mxu3 %vm522_vm1, %v1033_v29  ;;  %v670_v33 = vadd.f32 %v1841_v46, %v669_v32 }
 0x16c   : > { %v514_v34 = vmax.f32 %v473_v31, 0.0 }
 0x16d   : > { %744 = vst.msk [vmem:[%s1849_s8 + $0x58] sm:$0xff] %vm732_vm2, %v670_v33 }
 0x16e   : > { %v992_v35 = vpop.f32.mrf.mxu2  ;;  %v1182_v36 = vpop.f32.mrf.mxu3  ;;  %1405 = vmatmul.msk.f32.gmra.mxu1 %vm522_vm1, %v514_v34 }
 0x16f   : > { %v993_v37 = vadd.f32 %v1709_v44, %v992_v35  ;;  %v1183_v38 = vadd.f32 %v1841_v46, %v1182_v36 }
 0x171   : > { %v1034_v39 = vmax.f32 %v993_v37, 0.0  ;;  %1516 = vst.msk [vmem:[%s1849_s8 + $0x150] sm:$0xff] %vm732_vm2, %v1183_v38  ;;  %v475_v40 = vpop.f32.mrf.mxu0 }
 0x172   : > { %v476_v41 = vadd.f32 %v1709_v44, %v475_v40  ;;  %v672_v42 = vpop.f32.mrf.mxu1 }
 0x173   : > { %1501 = vmatmul.msk.f32.gmra.mxu3 %vm522_vm1, %v1034_v39  ;;  %v673_v43 = vadd.f32 %v1841_v46, %v672_v42 }
 0x174   : > { %v515_v45 = vmax.f32 %v476_v41, 0.0 }
 0x175   : > { %745 = vst.msk [vmem:[%s1849_s8 + $0x60] sm:$0xff] %vm732_vm2, %v673_v43 }
 0x176   : > { %v995_v47 = vpop.f32.mrf.mxu2  ;;  %v1185_v48 = vpop.f32.mrf.mxu3  ;;  %1406 = vmatmul.msk.f32.gmra.mxu1 %vm522_vm1, %v515_v45 }
 0x177   : > { %v996_v49 = vadd.f32 %v1709_v44, %v995_v47  ;;  %v1186_v50 = vadd.f32 %v1841_v46, %v1185_v48 }
 0x179   : > { %v1035_v51 = vmax.f32 %v996_v49, 0.0  ;;  %1517 = vst.msk [vmem:[%s1849_s8 + $0x158] sm:$0xff] %vm732_vm2, %v1186_v50  ;;  %v478_v52 = vpop.f32.mrf.mxu0 }
 0x17a   : > { %v479_v53 = vadd.f32 %v1709_v44, %v478_v52  ;;  %v675_v54 = vpop.f32.mrf.mxu1 }
 0x17b   : > { %1502 = vmatmul.msk.f32.gmra.mxu3 %vm522_vm1, %v1035_v51  ;;  %v676_v55 = vadd.f32 %v1841_v46, %v675_v54 }
 0x17c   : > { %v516_v56 = vmax.f32 %v479_v53, 0.0 }
 0x17d   : > { %746 = vst.msk [vmem:[%s1849_s8 + $0x68] sm:$0xff] %vm732_vm2, %v676_v55 }
 0x17e   : > { %v998_v57 = vpop.f32.mrf.mxu2  ;;  %v1188_v58 = vpop.f32.mrf.mxu3  ;;  %1407 = vmatmul.msk.f32.gmra.mxu1 %vm522_vm1, %v516_v56 }
 0x17f   : > { %v999_v59 = vadd.f32 %v1709_v44, %v998_v57  ;;  %v1189_v60 = vadd.f32 %v1841_v46, %v1188_v58 }
 0x181   : > { %v1036_v61 = vmax.f32 %v999_v59, 0.0  ;;  %1518 = vst.msk [vmem:[%s1849_s8 + $0x160] sm:$0xff] %vm732_vm2, %v1189_v60  ;;  %v481_v62 = vpop.f32.mrf.mxu0 }
 0x182   : > { %v482_v63 = vadd.f32 %v1709_v44, %v481_v62  ;;  %v678_v0 = vpop.f32.mrf.mxu1 }
 0x183   : > { %1503 = vmatmul.msk.f32.gmra.mxu3 %vm522_vm1, %v1036_v61  ;;  %v679_v1 = vadd.f32 %v1841_v46, %v678_v0 }
 0x184   : > { %v517_v2 = vmax.f32 %v482_v63, 0.0 }
 0x185   : > { %747 = vst.msk [vmem:[%s1849_s8 + $0x70] sm:$0xff] %vm732_vm2, %v679_v1 }
 0x186   : > { %v1001_v3 = vpop.f32.mrf.mxu2  ;;  %v1191_v4 = vpop.f32.mrf.mxu3  ;;  %1408 = vmatmul.msk.f32.gmra.mxu1 %vm522_vm1, %v517_v2 }
 0x187   : > { %v1002_v5 = vadd.f32 %v1709_v44, %v1001_v3  ;;  %v1192_v6 = vadd.f32 %v1841_v46, %v1191_v4 }
 0x189   : > { %v1037_v7 = vmax.f32 %v1002_v5, 0.0  ;;  %1519 = vst.msk [vmem:[%s1849_s8 + $0x168] sm:$0xff] %vm732_vm2, %v1192_v6  ;;  %v484_v8 = vpop.f32.mrf.mxu0 }
 0x18a   : > { %v485_v9 = vadd.f32 %v1709_v44, %v484_v8  ;;  %v681_v10 = vpop.f32.mrf.mxu1 }
 0x18b   : > { %1504 = vmatmul.msk.f32.gmra.mxu3 %vm522_vm1, %v1037_v7  ;;  %v682_v11 = vadd.f32 %v1841_v46, %v681_v10 }
 0x18c   : > { %v518_v12 = vmax.f32 %v485_v9, 0.0 }
 0x18d   : > { %748 = vst.msk [vmem:[%s1849_s8 + $0x78] sm:$0xff] %vm732_vm2, %v682_v11 }
 0x18e   : > { %v1004_v13 = vpop.f32.mrf.mxu2  ;;  %v1194_v14 = vpop.f32.mrf.mxu3  ;;  %1409 = vmatmul.msk.f32.gmra.mxu1 %vm522_vm1, %v518_v12 }
 0x18f   : > { %v1005_v15 = vadd.f32 %v1709_v44, %v1004_v13  ;;  %v1195_v16 = vadd.f32 %v1841_v46, %v1194_v14 }
 0x191   : > { %v1038_v17 = vmax.f32 %v1005_v15, 0.0  ;;  %1520 = vst.msk [vmem:[%s1849_s8 + $0x170] sm:$0xff] %vm732_vm2, %v1195_v16 }
 0x192   : > { %v684_v18 = vpop.f32.mrf.mxu1 }
 0x193   : > { %1505 = vmatmul.msk.f32.gmra.mxu3 %vm522_vm1, %v1038_v17  ;;  %v685_v19 = vadd.f32 %v1841_v46, %v684_v18 }
 0x195   : > { %749 = vst.msk [vmem:[%s1849_s8 + $0x80] sm:$0xff] %vm732_vm2, %v685_v19 }
 0x196   : > { %v1197_v20 = vpop.f32.mrf.mxu3 }
 0x197   : > { %v1198_v21 = vadd.f32 %v1841_v46, %v1197_v20 }
 0x199   : > { %1521 = vst.msk [vmem:[%s1849_s8 + $0x178] sm:$0xff] %vm732_vm2, %v1198_v21 }
 0x19b   : > { %v687_v44 = vpop.f32.mrf.mxu1 }
 0x19c   : > { %v688_v22 = vadd.f32 %v1841_v46, %v687_v44 }
 0x19e   : > { %v1200_v23 = vpop.f32.mrf.mxu3  ;;  %750 = vst.msk [vmem:[%s1849_s8 + $0x88] sm:$0xff] %vm732_vm2, %v688_v22 }
 0x19f   : > { %v1201_v24 = vadd.f32 %v1841_v46, %v1200_v23 }
 0x1a1   : > { %1522 = vst.msk [vmem:[%s1849_s8 + $0x180] sm:$0xff] %vm732_vm2, %v1201_v24 }
 0x1a3   : > { %v690_v25 = vpop.f32.mrf.mxu1 }
 0x1a4   : > { %v691_v26 = vadd.f32 %v1841_v46, %v690_v25 }
 0x1a6   : > { %v1203_v27 = vpop.f32.mrf.mxu3  ;;  %751 = vst.msk [vmem:[%s1849_s8 + $0x90] sm:$0xff] %vm732_vm2, %v691_v26 }
 0x1a7   : > { %v1204_v28 = vadd.f32 %v1841_v46, %v1203_v27 }
 0x1a9   : > { %1523 = vst.msk [vmem:[%s1849_s8 + $0x188] sm:$0xff] %vm732_vm2, %v1204_v28 }
 0x1ab   : > { %v693_v29 = vpop.f32.mrf.mxu1 }
 0x1ac   : > { %v694_v30 = vadd.f32 %v1841_v46, %v693_v29 }
 0x1ae   : > { %v1206_v31 = vpop.f32.mrf.mxu3  ;;  %752 = vst.msk [vmem:[%s1849_s8 + $0x98] sm:$0xff] %vm732_vm2, %v694_v30 }
 0x1af   : > { %v1207_v32 = vadd.f32 %v1841_v46, %v1206_v31 }
 0x1b1   : > { %1524 = vst.msk [vmem:[%s1849_s8 + $0x190] sm:$0xff] %vm732_vm2, %v1207_v32 }
 0x1b3   : > { %v696_v33 = vpop.f32.mrf.mxu1 }
 0x1b4   : > { %v697_v34 = vadd.f32 %v1841_v46, %v696_v33 }
 0x1b6   : > { %v1209_v35 = vpop.f32.mrf.mxu3  ;;  %753 = vst.msk [vmem:[%s1849_s8 + $0xa0] sm:$0xff] %vm732_vm2, %v697_v34 }
 0x1b7   : > { %v1210_v36 = vadd.f32 %v1841_v46, %v1209_v35 }
 0x1b9   : > { %1525 = vst.msk [vmem:[%s1849_s8 + $0x198] sm:$0xff] %vm732_vm2, %v1210_v36 }
 0x1bb   : > { %v699_v37 = vpop.f32.mrf.mxu1 }
 0x1bc   : > { %v700_v38 = vadd.f32 %v1841_v46, %v699_v37 }
 0x1be   : > { %v1212_v39 = vpop.f32.mrf.mxu3  ;;  %754 = vst.msk [vmem:[%s1849_s8 + $0xa8] sm:$0xff] %vm732_vm2, %v700_v38 }
 0x1bf   : > { %v1213_v40 = vadd.f32 %v1841_v46, %v1212_v39 }
 0x1c1   : > { %1526 = vst.msk [vmem:[%s1849_s8 + $0x1a0] sm:$0xff] %vm732_vm2, %v1213_v40 }
 0x1c3   : > { %v702_v41 = vpop.f32.mrf.mxu1 }
 0x1c4   : > { %v703_v42 = vadd.f32 %v1841_v46, %v702_v41 }
 0x1c6   : > { %v1215_v43 = vpop.f32.mrf.mxu3  ;;  %755 = vst.msk [vmem:[%s1849_s8 + $0xb0] sm:$0xff] %vm732_vm2, %v703_v42 }
 0x1c7   : > { %v1216_v45 = vadd.f32 %v1841_v46, %v1215_v43 }
 0x1c9   : > { %1527 = vst.msk [vmem:[%s1849_s8 + $0x1a8] sm:$0xff] %vm732_vm2, %v1216_v45 }
 0x1cb   : > { %v705_v47 = vpop.f32.mrf.mxu1 }
 0x1cc   : > { %v706_v48 = vadd.f32 %v1841_v46, %v705_v47 }
 0x1ce   : > { %v1218_v49 = vpop.f32.mrf.mxu3  ;;  %756 = vst.msk [vmem:[%s1849_s8 + $0xb8] sm:$0xff] %vm732_vm2, %v706_v48 }
 0x1cf   : > { %v1219_v50 = vadd.f32 %v1841_v46, %v1218_v49 }
 0x1d1   : > { %1528 = vst.msk [vmem:[%s1849_s8 + $0x1b0] sm:$0xff] %vm732_vm2, %v1219_v50 }
 0x1d3   : > { %v708_v51 = vpop.f32.mrf.mxu1 }
 0x1d4   : > { %v709_v52 = vadd.f32 %v1841_v46, %v708_v51 }
 0x1d6   : > { %v1221_v53 = vpop.f32.mrf.mxu3  ;;  %757 = vst.msk [vmem:[%s1849_s8 + $0xc0] sm:$0xff] %vm732_vm2, %v709_v52 }
 0x1d7   : > { %v1222_v54 = vadd.f32 %v1841_v46, %v1221_v53 }
 0x1d9   : > { %1529 = vst.msk [vmem:[%s1849_s8 + $0x1b8] sm:$0xff] %vm732_vm2, %v1222_v54 }
 0x1db   : > { %v711_v55 = vpop.f32.mrf.mxu1 }
 0x1dc   : > { %v712_v56 = vadd.f32 %v1841_v46, %v711_v55 }
 0x1de   : > { %v1224_v57 = vpop.f32.mrf.mxu3  ;;  %758 = vst.msk [vmem:[%s1849_s8 + $0xc8] sm:$0xff] %vm732_vm2, %v712_v56 }
 0x1df   : > { %v1225_v58 = vadd.f32 %v1841_v46, %v1224_v57 }
 0x1e1   : > { %1530 = vst.msk [vmem:[%s1849_s8 + $0x1c0] sm:$0xff] %vm732_vm2, %v1225_v58 }
 0x1e3   : > { %v714_v59 = vpop.f32.mrf.mxu1 }
 0x1e4   : > { %v715_v60 = vadd.f32 %v1841_v46, %v714_v59 }
 0x1e6   : > { %v1227_v61 = vpop.f32.mrf.mxu3  ;;  %759 = vst.msk [vmem:[%s1849_s8 + $0xd0] sm:$0xff] %vm732_vm2, %v715_v60 }
 0x1e7   : > { %v1228_v62 = vadd.f32 %v1841_v46, %v1227_v61 }
 0x1e9   : > { %1531 = vst.msk [vmem:[%s1849_s8 + $0x1c8] sm:$0xff] %vm732_vm2, %v1228_v62 }
 0x1eb   : > { %v717_v63 = vpop.f32.mrf.mxu1 }
 0x1ec   : > { %v718_v0 = vadd.f32 %v1841_v46, %v717_v63 }
 0x1ee   : > { %v1230_v1 = vpop.f32.mrf.mxu3  ;;  %760 = vst.msk [vmem:[%s1849_s8 + $0xd8] sm:$0xff] %vm732_vm2, %v718_v0 }
 0x1ef   : > { %v1231_v2 = vadd.f32 %v1841_v46, %v1230_v1 }
 0x1f1   : > { %1532 = vst.msk [vmem:[%s1849_s8 + $0x1d0] sm:$0xff] %vm732_vm2, %v1231_v2 }
 0x1f3   : > { %v720_v3 = vpop.f32.mrf.mxu1 }
 0x1f4   : > { %v721_v4 = vadd.f32 %v1841_v46, %v720_v3 }
 0x1f6   : > { %v1233_v5 = vpop.f32.mrf.mxu3  ;;  %761 = vst.msk [vmem:[%s1849_s8 + $0xe0] sm:$0xff] %vm732_vm2, %v721_v4 }
 0x1f7   : > { %v1234_v6 = vadd.f32 %v1841_v46, %v1233_v5 }
 0x1f9   : > { %1533 = vst.msk [vmem:[%s1849_s8 + $0x1d8] sm:$0xff] %vm732_vm2, %v1234_v6 }
 0x1fb   : > { %v723_v7 = vpop.f32.mrf.mxu1 }
 0x1fc   : > { %v724_v8 = vadd.f32 %v1841_v46, %v723_v7 }
 0x1fe   : > { %v1236_v9 = vpop.f32.mrf.mxu3  ;;  %762 = vst.msk [vmem:[%s1849_s8 + $0xe8] sm:$0xff] %vm732_vm2, %v724_v8 }
 0x1ff   : > { %v1237_v10 = vadd.f32 %v1841_v46, %v1236_v9 }
 0x201   : > { %1534 = vst.msk [vmem:[%s1849_s8 + $0x1e0] sm:$0xff] %vm732_vm2, %v1237_v10 }
 0x203   : > { %v726_v11 = vpop.f32.mrf.mxu1 }
 0x204   : > { %v727_v12 = vadd.f32 %v1841_v46, %v726_v11 }
 0x206   : > { %v1239_v13 = vpop.f32.mrf.mxu3  ;;  %763 = vst.msk [vmem:[%s1849_s8 + $0xf0] sm:$0xff] %vm732_vm2, %v727_v12 }
 0x207   : > { %v1240_v14 = vadd.f32 %v1841_v46, %v1239_v13 }
 0x209   : > { %1535 = vst.msk [vmem:[%s1849_s8 + $0x1e8] sm:$0xff] %vm732_vm2, %v1240_v14 }
 0x20b   : > { %v729_v15 = vpop.f32.mrf.mxu1 }
 0x20c   : > { %v730_v16 = vadd.f32 %v1841_v46, %v729_v15 }
 0x20e   : > { %v1242_v17 = vpop.f32.mrf.mxu3  ;;  %764 = vst.msk [vmem:[%s1849_s8 + $0xf8] sm:$0xff] %vm732_vm2, %v730_v16 }
 0x20f   : > { %v1243_v18 = vadd.f32 %v1841_v46, %v1242_v17 }
 0x211   : > { %1536 = vst.msk [vmem:[%s1849_s8 + $0x1f0] sm:$0xff] %vm732_vm2, %v1243_v18 }
 0x216   : > { %v1245_v19 = vpop.f32.mrf.mxu3 }
 0x217   : > { %v1246_v20 = vadd.f32 %v1841_v46, %v1245_v19 }
 0x219   : > { %1537 = vst.msk [vmem:[%s1849_s8 + $0x1f8] sm:$0xff] %vm732_vm2, %v1246_v20 }
 0x21a PF: > { %s15_s18 = sadd.s32 1, %s1556_s18  }
 0x21b   : > { %p12_p4 = scmp.ge.s32.totalorder %s15_s18, 4  }
 0x21d   :  { %14 = sbr.rel (!%p12_p4) target bundleno = 1 (0x1), region = 72 }

</bundles_post_ra>
